<compile_context>
chip_gen: v7x
topology: tpu7x:2x2x1
jax: 0.10.0
libtpu: 0.0.40
codegen_flags: <defaults>
</compile_context>

<pallas_src>
import jax
import jax.numpy as jnp
from jax import lax
from jax.experimental import pallas as pl
from jax.experimental.pallas import tpu as pltpu


def _inter_sma_kernel(x_ref, w1t_ref, bnb_ref, wk_ref, o_ref):
    # x_ref : (Bb, U, T, Cin)          channel-last input block
    # w1t   : (Cin, Ch)                conv1 weight, BN scale folded in
    # bnb   : (1, Ch)                  folded BN bias
    # wk    : (3, Ch, Cout)            conv2 taps (with identity/sign/mean factor)
    #                                  composed with conv3:  [Wk0, Wk1, Wk2]
    # o_ref : (Bb, T, Cout)
    Bb, U, T, Cin = x_ref.shape
    Ch = w1t_ref.shape[1]

    def mm(a, w):
        # Matmul in the weight dtype (f32 by default, bf16 optional); f32 accumulation.
        return jnp.dot(a.astype(w.dtype), w, preferred_element_type=jnp.float32)

    # conv1 (1x1, BN scale pre-folded) + BN bias + ReLU, batched over Bb*U*T rows.
    x = x_ref[...].reshape(Bb * U * T, Cin)
    y = jnp.maximum(mm(x, w1t_ref[...]) + bnb_ref[...], 0.0)
    y = y.reshape(Bb, U, T, Ch)

    # Linearity collapse of the pairwise-difference block:
    #   S = sum_{i<U-1} (y[i] + y[i+1]) = 2*sum_u(y) - y[:,0] - y[:,-1]
    S = 2.0 * jnp.sum(y, axis=1) - y[:, 0] - y[:, U - 1]          # (Bb, T, Ch)

    # sigmoid(conv3((S - conv2(S)) * 0.5/(U-1))) as three shifted matmuls on S:
    # the identity, minus signs, mean factor and the conv3 weight are all
    # pre-composed into wk (wrapper-side). Zero padding along T per batch row.
    zero = jnp.zeros((Bb, 1, Ch), jnp.float32)
    s_m1 = jnp.concatenate([zero, S[:, :-1, :]], axis=1)          # S at t-1
    s_p1 = jnp.concatenate([S[:, 1:, :], zero], axis=1)           # S at t+1
    logits = (mm(s_m1.reshape(Bb * T, Ch), wk_ref[0])
              + mm(S.reshape(Bb * T, Ch), wk_ref[1])
              + mm(s_p1.reshape(Bb * T, Ch), wk_ref[2]))          # (Bb*T, Cout)

    out = jax.nn.sigmoid(logits)                                  # EUP
    o_ref[...] = out.reshape(Bb, T, -1)


def inter_sma_forward(x_nchw, params, u, *, block_b=None, compute_dtype=jnp.float32):
    """x_nchw: (B*U, C_in, T, 1) f32. Returns (B, C_in, 1, T) to match PyTorch."""
    w1, gamma, beta, rmean, rvar, w2, w3, eps = params
    BU, Cin, T, N = x_nchw.shape
    assert N == 1, "InterSMA forward requires spatial width 1 (squeeze(-1))."
    assert u >= 2, "InterSMA requires u >= 2 (pairwise differences over u)."
    assert BU % u == 0, "leading dim must be divisible by u"
    B = BU // u
    Ch = w1.shape[0]
    Cout = w3.shape[0]

    # ---- glue: layout + one-time parameter folding (plain JAX, outside the kernel) ----
    x = x_nchw[..., 0].transpose(0, 2, 1).reshape(B, u, T, Cin).astype(jnp.float32)

    bn_scale = gamma / jnp.sqrt(rvar + eps)
    bn_bias = beta - rmean * bn_scale
    # conv1 weight with BN scale folded in: y = x @ w1t + bnb
    w1t = (jnp.transpose(w1[:, :, 0, 0]) * bn_scale[None, :]).astype(compute_dtype)   # (Cin, Ch)
    bnb = bn_bias.reshape(1, Ch).astype(jnp.float32)

    # conv2 taps (with identity / minus sign) composed with conv3 and the 0.5/(u-1)
    # averaging factor:  out = sigmoid(sum_k shift_k(S) @ wk[k]).
    eye = jnp.eye(Ch, dtype=jnp.float32)
    w3s = (0.5 / (u - 1)) * jnp.transpose(w3[:, :, 0, 0])                              # (Ch, Cout)
    wk = jnp.stack([
        (-jnp.transpose(w2[:, :, 0, 0])) @ w3s,
        (eye - jnp.transpose(w2[:, :, 1, 0])) @ w3s,
        (-jnp.transpose(w2[:, :, 2, 0])) @ w3s,
    ], axis=0).astype(compute_dtype)                                                   # (3, Ch, Cout)

    # ---- batch blocking: several B per grid step to fatten matmul M / amortize overhead.
    if block_b is None:
        block_b = next(bb for bb in (8, 4, 2, 1) if B % bb == 0)
    assert B % block_b == 0, "block_b must divide B"
    nb = B // block_b
    # NOTE: blocks here are tiny (< a few hundred KiB); if T or Cin grow, tile T in the
    # grid (multiples of 8) and set vmem_limit_bytes explicitly (v7x has 64 MiB VMEM).

    cost = pl.CostEstimate(
        flops=(2 * B * u * T * Cin * Ch          # conv1
               + 3 * 2 * B * T * Ch * Cout),     # collapsed conv2 (+folded conv3) on S
        transcendentals=B * T * Cout,            # sigmoid
        bytes_accessed=(x.size * 4 + B * T * Cout * 4
                        + (w1t.size + wk.size + bnb.size) * 4),
    )

    out = pl.pallas_call(
        _inter_sma_kernel,
        out_shape=jax.ShapeDtypeStruct((B, T, Cout), jnp.float32),
        grid=(nb,),
        in_specs=[
            pl.BlockSpec((block_b, u, T, Cin), lambda b: (b, 0, 0, 0)),
            # weights: constant index_maps -> fetched once / revisited, not per-step re-DMA'd
            pl.BlockSpec((Cin, Ch), lambda b: (0, 0)),
            pl.BlockSpec((1, Ch), lambda b: (0, 0)),
            pl.BlockSpec((3, Ch, Cout), lambda b: (0, 0, 0)),
        ],
        out_specs=pl.BlockSpec((block_b, T, Cout), lambda b: (b, 0, 0)),
        compiler_params=pltpu.CompilerParams(dimension_semantics=("parallel",)),
        cost_estimate=cost,
    )(x, w1t, bnb, wk)

    # back to PyTorch layout (B, C_out, 1, T)
    return out.transpose(0, 2, 1)[:, :, None, :]


# ---------------- pure-JAX reference (mirrors the PyTorch code) ----------------
def _ref_forward(x_nchw, params, u):
    w1, gamma, beta, rmean, rvar, w2, w3, eps = params

    def conv(a, w, pad):
        dn = lax.conv_dimension_numbers(a.shape, w.shape, ('NCHW', 'OIHW', 'NCHW'))
        return lax.conv_general_dilated(a, w, (1, 1), pad, dimension_numbers=dn)

    y = conv(x_nchw, w1, 'VALID')
    y = (y - rmean[None, :, None, None]) / jnp.sqrt(rvar + eps)[None, :, None, None]
    y = y * gamma[None, :, None, None] + beta[None, :, None, None]
    y = jnp.maximum(y, 0.0)

    BU, Ch, T, N = y.shape
    B = BU // u
    feat = y.reshape(B, u, Ch, T, N).transpose(1, 0, 2, 3, 4)           # (u, B, C, T, N)
    pad2 = ((1, 1), (0, 0))
    d1 = [feat[i] - conv(feat[i + 1], w2, pad2) for i in range(u - 1)]
    d2 = [feat[i + 1] - conv(feat[i], w2, pad2) for i in range(u - 1)]
    d1 = jnp.stack(d1, 0).transpose(1, 2, 0, 3, 4)[..., 0]              # (B, C, u-1, T)
    d1 = jnp.mean(d1, axis=-2, keepdims=True)                           # (B, C, 1, T)
    d2 = jnp.stack(d2, 0).transpose(1, 2, 0, 3, 4)[..., 0]
    d2 = jnp.mean(d2, axis=-2, keepdims=True)
    d = (d1 + d2) / 2
    return jax.nn.sigmoid(conv(d, w3, 'VALID'))


if __name__ == "__main__":
    # Small shapes consistent with the module: b=2, u=3, t=8, ch_in=16 (width=1).
    B, U, T, CIN = 2, 3, 8, 16
    CH = CIN // 2
    key = jax.random.PRNGKey(0)
    k = jax.random.split(key, 8)

    x = jax.random.normal(k[0], (B * U, CIN, T, 1), jnp.float32)

    # Deterministic parameter init (eval-mode BatchNorm with synthetic running stats).
    w1 = 0.2 * jax.random.normal(k[1], (CH, CIN, 1, 1), jnp.float32)
    w2 = 0.2 * jax.random.normal(k[2], (CH, CH, 3, 1), jnp.float32)
    w3 = 0.2 * jax.random.normal(k[3], (CIN, CH, 1, 1), jnp.float32)
    gamma = 1.0 + 0.1 * jax.random.normal(k[4], (CH,), jnp.float32)
    beta = 0.1 * jax.random.normal(k[5], (CH,), jnp.float32)
    rmean = 0.1 * jax.random.normal(k[6], (CH,), jnp.float32)
    rvar = jnp.abs(jax.random.normal(k[7], (CH,), jnp.float32)) + 0.5
    eps = 1e-5
    params = (w1, gamma, beta, rmean, rvar, w2, w3, eps)

    out = jax.block_until_ready(inter_sma_forward(x, params, U))
    ref = jax.block_until_ready(_ref_forward(x, params, U))

    assert out.shape == (B, CIN, 1, T), out.shape
    err = float(jnp.max(jnp.abs(out - ref)))
    assert jnp.allclose(out, ref, atol=3e-5, rtol=3e-5), err
    print("KERNEL_OK")
</pallas_src>

<mosaic_0001>
module attributes {stable_mosaic.version = 11 : i64} {
  func.func @_inter_sma_kernel(%arg0: i32, %arg1: memref<2x3x8x16xf32, #tpu.memory_space<vmem>>, %arg2: memref<16x8xf32, #tpu.memory_space<vmem>>, %arg3: memref<1x8xf32, #tpu.memory_space<vmem>>, %arg4: memref<3x8x16xf32, #tpu.memory_space<vmem>>, %arg5: memref<2x8x16xf32, #tpu.memory_space<vmem>>) attributes {dimension_semantics = [#tpu.dimension_semantics<parallel>], iteration_bounds = array<i64: 1>, scalar_prefetch = 0 : i64, scratch_operands = 0 : i64, tpu.core_type = #tpu.core_type<tc>, window_params = [{transform_indices = @transform_0, window_bounds = array<i64: 2, 3, 8, 16>}, {pipeline_mode = #tpu.pipeline_mode<synchronous>, transform_indices = @transform_1, window_bounds = array<i64: 16, 8>}, {pipeline_mode = #tpu.pipeline_mode<synchronous>, transform_indices = @transform_2, window_bounds = array<i64: 1, 8>}, {pipeline_mode = #tpu.pipeline_mode<synchronous>, transform_indices = @transform_3, window_bounds = array<i64: 3, 8, 16>}, {transform_indices = @transform_4, window_bounds = array<i64: 2, 8, 16>}]} {
    %c0 = arith.constant 0 : index
    %c0_0 = arith.constant 0 : index
    %c0_1 = arith.constant 0 : index
    %c0_2 = arith.constant 0 : index
    %0 = vector.load %arg1[%c0, %c0_0, %c0_1, %c0_2] : memref<2x3x8x16xf32, #tpu.memory_space<vmem>>, vector<2x3x8x16xf32>
    %1 = vector.shape_cast %0 : vector<2x3x8x16xf32> to vector<48x16xf32>
    %c0_3 = arith.constant 0 : index
    %c0_4 = arith.constant 0 : index
    %2 = vector.load %arg2[%c0_3, %c0_4] : memref<16x8xf32, #tpu.memory_space<vmem>>, vector<16x8xf32>
    %cst = arith.constant dense<0.000000e+00> : vector<48x8xf32>
    %3 = tpu.matmul %1, %2, %cst {dimension_numbers = #tpu.dot_dimension_numbers<[1], [0], [0], [1], [0, 0, 1, 1], [], []>} : vector<48x16xf32>, vector<16x8xf32>, vector<48x8xf32> -> vector<48x8xf32>
    %c0_5 = arith.constant 0 : index
    %c0_6 = arith.constant 0 : index
    %4 = vector.load %arg3[%c0_5, %c0_6] : memref<1x8xf32, #tpu.memory_space<vmem>>, vector<1x8xf32>
    %5 = vector.broadcast %4 : vector<1x8xf32> to vector<48x8xf32>
    %6 = arith.addf %3, %5 : vector<48x8xf32>
    %cst_7 = arith.constant 0.000000e+00 : f32
    %7 = vector.broadcast %cst_7 : f32 to vector<48x8xf32>
    %8 = arith.maximumf %6, %7 : vector<48x8xf32>
    %9 = vector.shape_cast %8 : vector<48x8xf32> to vector<2x3x8x8xf32>
    %cst_8 = arith.constant dense<0.000000e+00> : vector<2x8x8xf32>
    %10 = vector.multi_reduction <add>, %9, %cst_8 [1] : vector<2x3x8x8xf32> to vector<2x8x8xf32>
    %cst_9 = arith.constant 2.000000e+00 : f32
    %11 = vector.broadcast %cst_9 : f32 to vector<2x8x8xf32>
    %12 = arith.mulf %11, %10 : vector<2x8x8xf32>
    %13 = vector.extract_strided_slice %9 {offsets = [0, 0, 0, 0], sizes = [2, 1, 8, 8], strides = [1, 1, 1, 1]} : vector<2x3x8x8xf32> to vector<2x1x8x8xf32>
    %14 = vector.shape_cast %13 : vector<2x1x8x8xf32> to vector<2x8x8xf32>
    %15 = arith.subf %12, %14 : vector<2x8x8xf32>
    %16 = vector.extract_strided_slice %9 {offsets = [0, 2, 0, 0], sizes = [2, 1, 8, 8], strides = [1, 1, 1, 1]} : vector<2x3x8x8xf32> to vector<2x1x8x8xf32>
    %17 = vector.shape_cast %16 : vector<2x1x8x8xf32> to vector<2x8x8xf32>
    %18 = arith.subf %15, %17 : vector<2x8x8xf32>
    %cst_10 = arith.constant 0.000000e+00 : f32
    %19 = vector.broadcast %cst_10 : f32 to vector<2x1x8xf32>
    %20 = vector.extract_strided_slice %18 {offsets = [0, 0, 0], sizes = [2, 7, 8], strides = [1, 1, 1]} : vector<2x8x8xf32> to vector<2x7x8xf32>
    %21 = tpu.concatenate %19, %20 in 1 : vector<2x1x8xf32>, vector<2x7x8xf32> -> vector<2x8x8xf32>
    %22 = vector.extract_strided_slice %18 {offsets = [0, 1, 0], sizes = [2, 7, 8], strides = [1, 1, 1]} : vector<2x8x8xf32> to vector<2x7x8xf32>
    %23 = tpu.concatenate %22, %19 in 1 : vector<2x7x8xf32>, vector<2x1x8xf32> -> vector<2x8x8xf32>
    %24 = vector.shape_cast %21 : vector<2x8x8xf32> to vector<16x8xf32>
    %c0_11 = arith.constant 0 : index
    %c0_12 = arith.constant 0 : index
    %c0_13 = arith.constant 0 : index
    %25 = vector.load %arg4[%c0_11, %c0_12, %c0_13] : memref<3x8x16xf32, #tpu.memory_space<vmem>>, vector<1x8x16xf32>
    %26 = vector.shape_cast %25 : vector<1x8x16xf32> to vector<8x16xf32>
    %cst_14 = arith.constant dense<0.000000e+00> : vector<16x16xf32>
    %27 = tpu.matmul %24, %26, %cst_14 {dimension_numbers = #tpu.dot_dimension_numbers<[1], [0], [0], [1], [0, 0, 1, 1], [], []>} : vector<16x8xf32>, vector<8x16xf32>, vector<16x16xf32> -> vector<16x16xf32>
    %28 = vector.shape_cast %18 : vector<2x8x8xf32> to vector<16x8xf32>
    %c1 = arith.constant 1 : index
    %c0_15 = arith.constant 0 : index
    %c0_16 = arith.constant 0 : index
    %29 = vector.load %arg4[%c1, %c0_15, %c0_16] : memref<3x8x16xf32, #tpu.memory_space<vmem>>, vector<1x8x16xf32>
    %30 = vector.shape_cast %29 : vector<1x8x16xf32> to vector<8x16xf32>
    %cst_17 = arith.constant dense<0.000000e+00> : vector<16x16xf32>
    %31 = tpu.matmul %28, %30, %cst_17 {dimension_numbers = #tpu.dot_dimension_numbers<[1], [0], [0], [1], [0, 0, 1, 1], [], []>} : vector<16x8xf32>, vector<8x16xf32>, vector<16x16xf32> -> vector<16x16xf32>
    %32 = arith.addf %27, %31 : vector<16x16xf32>
    %33 = vector.shape_cast %23 : vector<2x8x8xf32> to vector<16x8xf32>
    %c2 = arith.constant 2 : index
    %c0_18 = arith.constant 0 : index
    %c0_19 = arith.constant 0 : index
    %34 = vector.load %arg4[%c2, %c0_18, %c0_19] : memref<3x8x16xf32, #tpu.memory_space<vmem>>, vector<1x8x16xf32>
    %35 = vector.shape_cast %34 : vector<1x8x16xf32> to vector<8x16xf32>
    %cst_20 = arith.constant dense<0.000000e+00> : vector<16x16xf32>
    %36 = tpu.matmul %33, %35, %cst_20 {dimension_numbers = #tpu.dot_dimension_numbers<[1], [0], [0], [1], [0, 0, 1, 1], [], []>} : vector<16x8xf32>, vector<8x16xf32>, vector<16x16xf32> -> vector<16x16xf32>
    %37 = arith.addf %32, %36 : vector<16x16xf32>
    %38 = arith.negf %37 : vector<16x16xf32>
    %39 = math.exp %38 : vector<16x16xf32>
    %cst_21 = arith.constant 1.000000e+00 : f32
    %40 = vector.broadcast %cst_21 : f32 to vector<16x16xf32>
    %41 = arith.addf %40, %39 : vector<16x16xf32>
    %42 = arith.divf %40, %41 : vector<16x16xf32>
    %43 = vector.shape_cast %42 : vector<16x16xf32> to vector<2x8x16xf32>
    %c0_22 = arith.constant 0 : index
    %c0_23 = arith.constant 0 : index
    %c0_24 = arith.constant 0 : index
    %44 = vector.load %arg5[%c0_22, %c0_23, %c0_24] : memref<2x8x16xf32, #tpu.memory_space<vmem>>, vector<2x8x16xf32>
    tpu.vector_store %arg5[%c0_22, %c0_23, %c0_24], %43 {strides = array<i32>} : memref<2x8x16xf32, #tpu.memory_space<vmem>>, vector<2x8x16xf32>,
    return
  }
  func.func @transform_0(%arg0: i32) -> (i32, i32, i32, i32) {
    %c0_i32 = arith.constant 0 : i32
    %c0_i32_0 = arith.constant 0 : i32
    %c0_i32_1 = arith.constant 0 : i32
    %c0_i32_2 = arith.constant 0 : i32
    return %arg0, %c0_i32, %c0_i32_0, %c0_i32_1 : i32, i32, i32, i32
  }
  func.func @transform_1(%arg0: i32) -> (i32, i32) {
    %c0_i32 = arith.constant 0 : i32
    %c0_i32_0 = arith.constant 0 : i32
    %c0_i32_1 = arith.constant 0 : i32
    return %c0_i32, %c0_i32_0 : i32, i32
  }
  func.func @transform_2(%arg0: i32) -> (i32, i32) {
    %c0_i32 = arith.constant 0 : i32
    %c0_i32_0 = arith.constant 0 : i32
    %c0_i32_1 = arith.constant 0 : i32
    return %c0_i32, %c0_i32_0 : i32, i32
  }
  func.func @transform_3(%arg0: i32) -> (i32, i32, i32) {
    %c0_i32 = arith.constant 0 : i32
    %c0_i32_0 = arith.constant 0 : i32
    %c0_i32_1 = arith.constant 0 : i32
    %c0_i32_2 = arith.constant 0 : i32
    return %c0_i32, %c0_i32_0, %c0_i32_1 : i32, i32, i32
  }
  func.func @transform_4(%arg0: i32) -> (i32, i32, i32) {
    %c0_i32 = arith.constant 0 : i32
    %c0_i32_0 = arith.constant 0 : i32
    %c0_i32_1 = arith.constant 0 : i32
    return %arg0, %c0_i32, %c0_i32_0 : i32, i32, i32
  }
}

</mosaic_0001>

<bundles_post_ra>
// kernel: tpu_custom_call.1
= control target key start
LH: loop header
LB: loop body
LE: loop exit
PB: predicated region body
PF: predicated region fallthrough
CT: control target
= control target key end

     0   :  { %9 = vsyncpa [#allocation3], 0  ;;  %s706_s0 = inlined_call_operand.hbm [shape: f32[2,3,8,16], index: 0, kind: input, shape index: {}]   ;;  %s707_s1 = inlined_call_operand.vmem [shape: f32[16,8], index: 1, kind: input, shape index: {}]   ;;  %s708_s2 = inlined_call_operand.vmem [shape: f32[1,8], index: 2, kind: input, shape index: {}]   ;;  %s709_s3 = inlined_call_operand.vmem [shape: f32[3,8,16], index: 3, kind: input, shape index: {}]   ;;  %s710_s4 = inlined_call_operand.hbm [shape: f32[2,8,16], index: 4, kind: output, shape index: {}]  }
   0x1   :  { %10 = vsyncpa [#allocation4], 0  ;;  %s609_s15 = smov [#allocation2]   ;;  %s561_s19 = scalar_lea.hbm %s706_s0, 768 }
   0x2   :  { %s16_s16 = sshll.u32 %s609_s15, 4  ;;  %p562_p0 = scmp.ne.s32.totalorder %s706_s0, %s561_s19  ;;  %s17_s16 = int_to_ptr.vmem [resolvable:$true] %s16_s16 }
   0x3   :  { %p565_p1 = scmp.lt.u32.totalorder %s561_s19, %s706_s0 }
   0x5   :  { %p567_p2 = pnand %p565_p1, %p562_p0 }
   0x7   :  { %570 = shalt.err (!%p567_p2)
}
   0x8   :  { %s571_s24 = scalar_lea.vmem %s17_s16, 768  ;;  %p576_p4 = scmp.lt.s32.totalorder %s17_s16, %s17_s16 }
   0x9   :  { %p572_p3 = scmp.ne.s32.totalorder %s17_s16, %s571_s24  ;;  %p577_p5 = scmp.lt.s32.totalorder %s571_s24, %s571_s24 }
   0xb   :  { %p578_p6 = por %p577_p5, %p576_p4 }
   0xd   :  { %p579_p7 = pnand %p578_p6, %p572_p3 }
   0xf   :  { %582 = shalt.err (!%p579_p7)
}
  0x10   :  { %s610_s25 = smov 128   ;;  %s611_s26 = smov 8  }
  0x11   :  { %22 = dma.hbm_to_vmem [thread:$0]  %s706_s0, 768, %s17_s16, [#allocation3], %s610_s25, %s610_s25, %s611_s26  }
  0x12   :  { %605 = dma.done.wait [#allocation3], 768  }
  0x13   :  { %606 = vsyncadd [#allocation3], 4294966528  ;;  %vm47_vm0 = vcmask 130048   ;;  %v38_v0 = vld [vmem:[%s707_s1] sm:$0xff]  ;;  %v39_v1 = vld [vmem:[%s707_s1 + $0x8] sm:$0xff]  ;;  %vm167_vm1 = vcmask 64512  }
  0x14   :  { %v32_v2 = vld [vmem:[#allocation2] sm:$0xff]  ;;  %v541_v3 = vpack.c.bf16 %v39_v1, %v38_v0  ;;  %v33_v4 = vld [vmem:[#allocation2 + $0x8] sm:$0xff]  ;;  %v34_v5 = vld [vmem:[#allocation2 + $0x10] sm:$0xff]  ;;  %vm190_vm2 = vcmask 1040384   ;;  %vm197_vm3 = vcmask 1046528  }
  0x15   :  { %517 = vmatprep.mubr.msk.f32.mxu0 %vm47_vm0, %v32_v2  ;;  %v35_v6 = vld [vmem:[#allocation2 + $0x18] sm:$0xff]  ;;  %v36_v7 = vld [vmem:[#allocation2 + $0x20] sm:$0xff]  ;;  %v37_v8 = vld [vmem:[#allocation2 + $0x28] sm:$0xff] }
  0x16   :  { %542 = vmatprep.subr.bf16.mxu0 %v541_v3  ;;  %v486_v9 = vld [vmem:[%s709_s3 + $0x8] sm:$0xff]  ;;  %v200_v10 = vld [vmem:[%s709_s3] sm:$0xff]  ;;  %v491_v47 = vld [vmem:[%s709_s3 + $0x10] sm:$0xff]  ;;  %s612_s3 = smov [#allocation5]  }
  0x17   :  { %544 = vmatpush3.bf16.msra.mxu0 %v541_v3  ;;  %526 = vmatprep.subr.mxu1 %v486_v9  ;;  %v479_v11 = vld [vmem:[%s708_s2] ss:$0 sm:$0xff]  ;;  %s467_s12 = sshll.u32 %s612_s3, 4  ;;  %s468_s12 = int_to_ptr.vmem [resolvable:$true] %s467_s12 }
  0x18   :  { %527 = vmatpush3.msra.mxu1 %v486_v9  ;;  %s583_s13 = scalar_lea.vmem %s468_s12, 256  ;;  %p588_p9 = scmp.lt.s32.totalorder %s468_s12, %s468_s12 }
  0x19   :  { %531 = vmatprep.subr.mxu1 %v200_v10  ;;  %p584_p8 = scmp.ne.s32.totalorder %s468_s12, %s583_s13  ;;  %p589_p10 = scmp.lt.s32.totalorder %s583_s13, %s583_s13 }
  0x1a   :  { %518 = vmatmul.mubr.msk.f32.vlgmr.msra.gmra.mrb[0].mxu0 %vm47_vm0, %v33_v4 }
  0x1b   :  { %520 = vmatprep.mubr.msk.f32.mxu0 %vm47_vm0, %v34_v5  ;;  %p590_p11 = por %p589_p10, %p588_p9 }
  0x1d   :  { %p591_p12 = pnand %p590_p11, %p584_p8 }
  0x1e   :  { %521 = vmatmul.mubr.msk.f32.gmra.mrb[2].mxu0 %vm47_vm0, %v35_v6 }
  0x1f   :  { %523 = vmatprep.mubr.msk.f32.mxu0 %vm47_vm0, %v36_v7 }
  0x22   :  { %524 = vmatmul.mubr.msk.f32.gmra.mrb[4].mxu0 %vm47_vm0, %v37_v8 }
  0xed   :  { %v519_v12 = vpop.f32.mrb[0].mxu0 }
  0xee   :  { %v138_v13 = vadd.f32 %v519_v12, %v479_v11  ;;  %v132_v14 = vpop.f32.mrb[1].mxu0 }
  0xef   :  { %v133_v15 = vadd.f32 %v479_v11, %v132_v14 }
  0xf0   :  { %v162_v16 = vmax.f32 %v138_v13, 0.0 }
  0xf1   :  { %v161_v17 = vmax.f32 %v133_v15, 0.0  ;;  %v522_v18 = vpop.f32.mrb[2].mxu0 }
  0xf2   :  { %v169_v19 = vsel %vm167_vm1, %v162_v16, 0.0  ;;  %v142_v20 = vpop.f32.mrb[3].mxu0  ;;  %v148_v22 = vadd.f32 %v522_v18, %v479_v11 }
  0xf3   :  { %v168_v21 = vsel %vm167_vm1, %v161_v17, 0.0  ;;  %v143_v23 = vadd.f32 %v479_v11, %v142_v20 }
  0xf4   :  { %v170_v24 = vadd.f32 %v169_v19, %v168_v21  ;;  %v164_v29 = vmax.f32 %v148_v22, 0.0 }
  0xf5   :  { %v163_v25 = vmax.f32 %v143_v23, 0.0  ;;  %v525_v26 = vpop.f32.mrb[4].mxu0 }
  0xf6   :  { %v158_v27 = vadd.f32 %v525_v26, %v479_v11  ;;  %v152_v28 = vpop.f32.mrb[5].mxu0  ;;  %v173_v36 = vsel %vm167_vm1, %v164_v29, 0.0 }
  0xf7   :  { %v171_v30 = vsel %vm167_vm1, %v163_v25, 0.0  ;;  %v153_v31 = vadd.f32 %v479_v11, %v152_v28 }
  0xf8   :  { %v172_v32 = vadd.f32 %v171_v30, %v170_v24  ;;  %v166_v33 = vmax.f32 %v158_v27, 0.0 }
  0xf9   :  { %v165_v34 = vmax.f32 %v153_v31, 0.0 }
  0xfa   :  { %v178_v35 = vmul.f32 2.0, %v172_v32  ;;  %v176_v40 = vsel %vm167_vm1, %v166_v33, 0.0 }
  0xfb   :  { %v174_v37 = vsel %vm167_vm1, %v165_v34, 0.0 }
  0xfc   :  { %v180_v38 = vsub.f32 %v178_v35, %v161_v17  ;;  %v175_v39 = vadd.f32 %v174_v37, %v173_v36 }
  0xfe   :  { %v182_v41 = vsub.f32 %v180_v38, %v163_v25  ;;  %v177_v42 = vadd.f32 %v176_v40, %v175_v39 }
 0x100   :  { %v179_v43 = vmul.f32 2.0, %v177_v42  ;;  %528 = vmatprep.mubr.msk.f32.mxu1 %vm167_vm1, %v182_v41  ;;  %v186_v45 = vrot.slane %v182_v41, 7  ;;  %v193_v50 = vrot.slane %v182_v41, 1 }
 0x102   :  { %v181_v44 = vsub.f32 %v179_v43, %v164_v29  ;;  %v191_v48 = vsel %vm190_vm2, 0.0, %v186_v45  ;;  %v198_v52 = vsel %vm197_vm3, %v193_v50, 0.0 }
 0x104   :  { %v183_v46 = vsub.f32 %v181_v44, %v166_v33 }
 0x106   :  { %529 = vmatmul.mubr.msk.f32.vlgmr.msra.gmra.mrb[0].mxu1 %vm167_vm1, %v183_v46  ;;  %v187_v49 = vrot.slane %v183_v46, 7  ;;  %v194_v53 = vrot.slane %v183_v46, 1 }
 0x107   :  { %532 = vmatpush3.msra.mxu1 %v200_v10  ;;  %533 = vmatprep.mubr.msk.f32.mxu1 %vm167_vm1, %v191_v48 }
 0x108   :  { %536 = vmatprep.subr.mxu1 %v491_v47  ;;  %v192_v51 = vsel %vm190_vm2, 0.0, %v187_v49  ;;  %v199_v54 = vsel %vm197_vm3, %v194_v53, 0.0 }
 0x10e   :  { %534 = vmatmul.mubr.msk.f32.vlgmr.msra.gmra.mrb[0].mxu1 %vm167_vm1, %v192_v51 }
 0x10f   :  { %537 = vmatpush3.msra.mxu1 %v491_v47  ;;  %538 = vmatprep.mubr.msk.f32.mxu1 %vm167_vm1, %v198_v52 }
 0x116   :  { %539 = vmatmul.mubr.msk.f32.vlgmr.msra.gmra.mrb[0].mxu1 %vm167_vm1, %v199_v54 }
 0x1e9   :  { %v540_v55 = vpop.f32.mrb[0].mxu1 }
 0x1ea   :  { %v495_v56 = vmul.f32 -1.442695, %v540_v55  ;;  %v437_v57 = vpop.f32.mrb[1].mxu1 }
 0x1eb   :  { %v494_v58 = vmul.f32 -1.442695, %v437_v57 }
 0x1ec   :  { %553 = vpow2.f32 %v495_v56 }
 0x1ed   :  { %555 = vpow2.f32 %v494_v58 }
 0x1f6   :  { %v554_v59 = vpop.eup %553 }
 0x1f7   :  { %v556_v60 = vpop.eup %555  ;;  %v455_v61 = vadd.f32 1.0, %v554_v59 }
 0x1f8   :  { %v454_v62 = vadd.f32 1.0, %v556_v60 }
 0x1f9   :  { %557 = vrcp.f32 %v455_v61 }
 0x1fa   :  { %559 = vrcp.f32 %v454_v62 }
 0x203   :  { %v558_v63 = vpop.eup %557 }
 0x204   :  { %v560_v0 = vpop.eup %559  ;;  %461 = vst.msk [vmem:[#allocation5 + $0x8] sm:$0xff] %vm47_vm0, %v558_v63 }
 0x205   :  { %460 = vst.msk [vmem:[#allocation5] sm:$0xff] %vm47_vm0, %v560_v0 }
 0x206   :  { %594 = shalt.err (!%p591_p12)
}
 0x207   :  { %s595_s16 = scalar_lea.hbm %s710_s4, 256 }
 0x208   :  { %p596_p13 = scmp.ne.s32.totalorder %s710_s4, %s595_s16  ;;  %p599_p0 = scmp.lt.u32.totalorder %s595_s16, %s710_s4 }
 0x20a   :  { %p601_p1 = pnand %p599_p0, %p596_p13 }
 0x20c   :  { %604 = shalt.err (!%p601_p1)
}
 0x20d   :  { %473 = dma.vmem_to_hbm [thread:$0]  %s468_s12, 256, %s710_s4, [#allocation4], %s610_s25, %s610_s25, %s611_s26  }
 0x20e   :  { %607 = dma.done.wait [#allocation4], 256  }
 0x20f   :  { %608 = vsyncadd [#allocation4], 4294967040 }
 0x210   :  { %477 = vsyncpa [#allocation3], 1 }
 0x211   :  { %478 = vsyncpa [#allocation4], 1 }

</bundles_post_ra>
